<compile_context>
chip_gen: v5e
topology: v5e:2x2
jax: 0.10.0
libtpu: 0.0.40
codegen_flags: <defaults>
</compile_context>

<pallas_src>
import functools
import math

import jax
import jax.numpy as jnp
from jax import lax
from jax.experimental import pallas as pl
from jax.experimental.pallas import tpu as pltpu


def gen_wavelength_embedding(d_model: int, max_length: int) -> jnp.ndarray:
    """JAX port of the sinusoidal table. Returns (max_length, d_model) f32."""
    position = jnp.arange(0, max_length, dtype=jnp.float32)[:, None]
    div_term = jnp.exp(
        jnp.arange(0, d_model, 2, dtype=jnp.float32) * -(math.log(10000.0) / d_model)
    )
    pe = jnp.zeros((max_length, d_model), dtype=jnp.float32)
    pe = pe.at[:, 0::2].set(jnp.sin(position * div_term))
    pe = pe.at[:, 1::2].set(jnp.cos(position * div_term))
    return pe


def _round_up(x: int, m: int) -> int:
    return ((x + m - 1) // m) * m


def _embed_kernel(T, S_pad, vocab,
                  ids_ref, word_hbm, pos_ref, o_ref, rows_ref, sem_ref):
    # ids_ref : SMEM (B*S_pad,) int32 token ids (scalar prefetch)
    # word_hbm: HBM (vocab, D) word table (memory_space=pl.ANY)
    # pos_ref : VMEM (T, D) positional rows for this seq tile
    # o_ref   : VMEM (T, D) output block
    # rows_ref: VMEM (T, D) scratch receiving the gathered word rows
    # sem_ref : (1,) DMA semaphore shared by the T row copies
    j = pl.program_id(0)          # seq-tile index
    b = pl.program_id(1)          # batch index
    base = b * S_pad + j * T

    def _start(t, carry):
        # Clamp for safety (OOB ids would otherwise be an HBM DMA fault).
        tok = jnp.minimum(ids_ref[base + t], vocab - 1)
        pltpu.make_async_copy(
            word_hbm.at[pl.ds(tok, 1), :],
            rows_ref.at[pl.ds(t, 1), :],
            sem_ref.at[0],
        ).start()
        return carry

    lax.fori_loop(0, T, _start, 0)

    def _wait(t, carry):
        pltpu.make_async_copy(
            word_hbm.at[pl.ds(0, 1), :],      # same byte count as the real copy
            rows_ref.at[pl.ds(t, 1), :],
            sem_ref.at[0],
        ).wait()
        return carry

    lax.fori_loop(0, T, _wait, 0)

    o_ref[...] = rows_ref[...] + pos_ref[...]


def embedder_forward(ids: jnp.ndarray,
                     word_emb: jnp.ndarray,
                     pos_table: jnp.ndarray,
                     *,
                     tokens_per_tile: int = 128) -> jnp.ndarray:
    """ids: (B, S) int; word_emb: (vocab, D); pos_table: (>=S, D)."""
    B, S = ids.shape
    vocab, D = word_emb.shape

    # Token tile size: multiple of 8 (sublane-dense output), capped at 128.
    T = min(tokens_per_tile, _round_up(S, 8))
    T = _round_up(T, 8)
    S_pad = _round_up(S, T)
    n_tiles = S_pad // T

    ids_pad = ids.astype(jnp.int32)
    if S_pad != S:
        ids_pad = jnp.pad(ids_pad, ((0, 0), (0, S_pad - S)))  # id 0 is valid
    ids_flat = ids_pad.reshape(-1)

    if pos_table.shape[0] >= S_pad:
        pos_use = pos_table[:S_pad]
    else:
        pos_use = jnp.pad(pos_table, ((0, S_pad - pos_table.shape[0]), (0, 0)))
    pos_use = pos_use.astype(word_emb.dtype)

    kernel = functools.partial(_embed_kernel, T, S_pad, vocab)

    out_flat = pl.pallas_call(
        kernel,
        out_shape=jax.ShapeDtypeStruct((B * S_pad, D), word_emb.dtype),
        grid_spec=pltpu.PrefetchScalarGridSpec(
            num_scalar_prefetch=1,
            grid=(n_tiles, B),
            in_specs=[
                # Word table stays in HBM; gathered row-by-row in the kernel.
                pl.BlockSpec(memory_space=pl.ANY),
                # Dense positional tile; index repeats across the batch axis
                # so the block stays resident in VMEM.
                pl.BlockSpec((T, D), lambda j, b, ids: (j, 0)),
            ],
            out_specs=pl.BlockSpec(
                (T, D), lambda j, b, ids: (b * n_tiles + j, 0)),
            scratch_shapes=[
                pltpu.VMEM((T, D), word_emb.dtype),
                pltpu.SemaphoreType.DMA((1,)),
            ],
        ),
        compiler_params=pltpu.CompilerParams(
            dimension_semantics=("parallel", "parallel")),
    )(ids_flat, word_emb, pos_use)

    out = out_flat.reshape(B, S_pad, D)
    if S_pad != S:
        out = out[:, :S, :]
    return out


class EmbedderPallas:
    """Mirror of the PyTorch Embedder (parameters initialized in-script)."""

    def __init__(self, d_model: int, vocab_size: int, max_length: int,
                 use_sin_pos: bool = False, *, key=None):
        if key is None:
            key = jax.random.PRNGKey(0)
        k_word, k_pos = jax.random.split(key)
        # nn.Embedding default init ~ N(0, 1)
        self.word_emb = jax.random.normal(k_word, (vocab_size, d_model),
                                          dtype=jnp.float32)
        self.use_sin_pos = use_sin_pos
        if use_sin_pos:
            self.pos_emb = gen_wavelength_embedding(d_model, max_length)
        else:
            self.pos_emb = jax.random.normal(k_pos, (max_length, d_model),
                                             dtype=jnp.float32)

    def __call__(self, x: jnp.ndarray) -> jnp.ndarray:
        # x: (batch, seq) integer token ids -> (batch, seq, d_model)
        return embedder_forward(x, self.word_emb, self.pos_emb)


def _reference(ids, word_emb, pos_emb):
    B, S = ids.shape
    return word_emb[ids] + pos_emb[jnp.arange(S)][None, :, :]


if __name__ == "__main__":
    batch, seq_len = 2, 8
    d_model, vocab_size, max_length = 128, 64, 16

    key = jax.random.PRNGKey(0)
    k_ids, k_params = jax.random.split(key)
    x = jax.random.randint(k_ids, (batch, seq_len), 0, vocab_size, dtype=jnp.int32)

    ok = True
    for use_sin_pos in (False, True):
        mod = EmbedderPallas(d_model, vocab_size, max_length,
                             use_sin_pos=use_sin_pos, key=k_params)
        out = mod(x)
        out = jax.block_until_ready(out)
        ref = _reference(x, mod.word_emb, mod.pos_emb)
        ok = ok and bool(jnp.allclose(out, ref, atol=1e-5, rtol=1e-5))
        ok = ok and (out.shape == (batch, seq_len, d_model))

    if ok:
        print("KERNEL_OK")
    else:
        raise SystemExit("mismatch vs reference")
</pallas_src>

<mosaic_0001>
module attributes {stable_mosaic.version = 11 : i64} {
  func.func @_embed_kernel(%arg0: i32, %arg1: i32, %arg2: memref<16xi32, #tpu.memory_space<smem>>, %arg3: memref<64x128xf32, #tpu.memory_space<any>>, %arg4: memref<8x128xf32, #tpu.memory_space<vmem>>, %arg5: memref<8x128xf32, #tpu.memory_space<vmem>>, %arg6: memref<8x128xf32, #tpu.memory_space<vmem>>, %arg7: memref<1x!tpu.dma_semaphore, #tpu.memory_space<semaphore_mem>>) attributes {dimension_semantics = [#tpu.dimension_semantics<parallel>, #tpu.dimension_semantics<parallel>], iteration_bounds = array<i64: 1, 2>, scalar_prefetch = 1 : i64, scratch_operands = 2 : i64, tpu.core_type = #tpu.core_type<tc>, window_params = [{}, {transform_indices = @transform_1, window_bounds = array<i64: 8, 128>}, {transform_indices = @transform_2, window_bounds = array<i64: 8, 128>}]} {
    %c8_i32 = arith.constant 8 : i32
    %0 = arith.muli %arg1, %c8_i32 : i32
    %c8_i32_0 = arith.constant 8 : i32
    %1 = arith.muli %arg0, %c8_i32_0 : i32
    %2 = arith.addi %0, %1 : i32
    %c0_i32 = arith.constant 0 : i32
    %c8_i32_1 = arith.constant 8 : i32
    %3 = arith.addi %c0_i32, %c8_i32_1 : i32
    %c1_i32 = arith.constant 1 : i32
    scf.for %arg8 = %c0_i32 to %3 step %c1_i32  : i32 {
      %9 = arith.addi %2, %arg8 : i32
      %10 = arith.index_cast %9 : i32 to index
      %11 = memref.load %arg2[%10] : memref<16xi32, #tpu.memory_space<smem>>
      %c63_i32 = arith.constant 63 : i32
      %12 = arith.minsi %11, %c63_i32 : i32
      %c0_i32_12 = arith.constant 0 : i32
      %c0_i32_13 = arith.constant 0 : i32
      %13 = tpu.memref_slice %arg3[%12, %c0_i32_13] : memref<64x128xf32, #tpu.memory_space<any>> -> memref<1x128xf32, #tpu.memory_space<any>>
      %c0_i32_14 = arith.constant 0 : i32
      %14 = tpu.memref_slice %arg6[%arg8, %c0_i32_14] : memref<8x128xf32, #tpu.memory_space<vmem>> -> memref<1x128xf32, #tpu.memory_space<vmem>>
      %15 = tpu.memref_slice %arg7[%c0_i32_12] : memref<1x!tpu.dma_semaphore, #tpu.memory_space<semaphore_mem>> -> memref<1x!tpu.dma_semaphore, #tpu.memory_space<semaphore_mem>>
      %16 = tpu.memref_squeeze %15 : memref<1x!tpu.dma_semaphore, #tpu.memory_space<semaphore_mem>> -> memref<!tpu.dma_semaphore, #tpu.memory_space<semaphore_mem>>
      tpu.enqueue_dma source(%13 : memref<1x128xf32, #tpu.memory_space<any>>) target(%14 : memref<1x128xf32, #tpu.memory_space<vmem>>) target_semaphore(%16 : memref<!tpu.dma_semaphore, #tpu.memory_space<semaphore_mem>>)
    }
    %c8_i32_2 = arith.constant 8 : i32
    %c0_i32_3 = arith.constant 0 : i32
    %c8_i32_4 = arith.constant 8 : i32
    %4 = arith.addi %c0_i32_3, %c8_i32_4 : i32
    %c1_i32_5 = arith.constant 1 : i32
    scf.for %arg8 = %c0_i32_3 to %4 step %c1_i32_5  : i32 {
      %c0_i32_12 = arith.constant 0 : i32
      %c0_i32_13 = arith.constant 0 : i32
      %c0_i32_14 = arith.constant 0 : i32
      %9 = tpu.memref_slice %arg3[%c0_i32_13, %c0_i32_14] : memref<64x128xf32, #tpu.memory_space<any>> -> memref<1x128xf32, #tpu.memory_space<any>>
      %c0_i32_15 = arith.constant 0 : i32
      %10 = tpu.memref_slice %arg6[%arg8, %c0_i32_15] : memref<8x128xf32, #tpu.memory_space<vmem>> -> memref<1x128xf32, #tpu.memory_space<vmem>>
      %11 = tpu.memref_slice %arg7[%c0_i32_12] : memref<1x!tpu.dma_semaphore, #tpu.memory_space<semaphore_mem>> -> memref<1x!tpu.dma_semaphore, #tpu.memory_space<semaphore_mem>>
      %12 = tpu.memref_squeeze %11 : memref<1x!tpu.dma_semaphore, #tpu.memory_space<semaphore_mem>> -> memref<!tpu.dma_semaphore, #tpu.memory_space<semaphore_mem>>
      tpu.wait_dma2 semaphore(%12 : memref<!tpu.dma_semaphore, #tpu.memory_space<semaphore_mem>>) src(%9 : memref<1x128xf32, #tpu.memory_space<any>>) dst(%10 : memref<1x128xf32, #tpu.memory_space<vmem>>)
    }
    %c8_i32_6 = arith.constant 8 : i32
    %c0 = arith.constant 0 : index
    %c0_7 = arith.constant 0 : index
    %5 = vector.load %arg6[%c0, %c0_7] : memref<8x128xf32, #tpu.memory_space<vmem>>, vector<8x128xf32>
    %c0_8 = arith.constant 0 : index
    %c0_9 = arith.constant 0 : index
    %6 = vector.load %arg4[%c0_8, %c0_9] : memref<8x128xf32, #tpu.memory_space<vmem>>, vector<8x128xf32>
    %7 = arith.addf %5, %6 : vector<8x128xf32>
    %c0_10 = arith.constant 0 : index
    %c0_11 = arith.constant 0 : index
    %8 = vector.load %arg5[%c0_10, %c0_11] : memref<8x128xf32, #tpu.memory_space<vmem>>, vector<8x128xf32>
    tpu.vector_store %arg5[%c0_10, %c0_11], %7 {strides = array<i32>} : memref<8x128xf32, #tpu.memory_space<vmem>>, vector<8x128xf32>,
    return
  }
  func.func @transform_1(%arg0: i32, %arg1: i32, %arg2: memref<16xi32, #tpu.memory_space<smem>>) -> (i32, i32) {
    %c0_i32 = arith.constant 0 : i32
    %c0_i32_0 = arith.constant 0 : i32
    return %arg0, %c0_i32 : i32, i32
  }
  func.func @transform_2(%arg0: i32, %arg1: i32, %arg2: memref<16xi32, #tpu.memory_space<smem>>) -> (i32, i32) {
    %c1_i32 = arith.constant 1 : i32
    %0 = arith.muli %arg1, %c1_i32 : i32
    %1 = arith.addi %0, %arg0 : i32
    %c0_i32 = arith.constant 0 : i32
    %c0_i32_0 = arith.constant 0 : i32
    return %1, %c0_i32 : i32, i32
  }
}

</mosaic_0001>

<bundles_post_ra>
// kernel: tpu_custom_call.1
= control target key start
LH: loop header
LB: loop body
LE: loop exit
PB: predicated region body
PF: predicated region fallthrough
CT: control target
= control target key end

     0   :  { %s554_s15 = smov [#allocation5]   ;;  %s709_s0 = inlined_call_operand.hbm [shape: s32[16], index: 0, kind: input, shape index: {}]   ;;  %s710_s1 = inlined_call_operand.hbm [shape: f32[64,128], index: 1, kind: input, shape index: {}]   ;;  %s711_s2 = inlined_call_operand.hbm [shape: f32[8,128], index: 2, kind: input, shape index: {}]   ;;  %s712_s3 = inlined_call_operand.hbm [shape: f32[16,128], index: 3, kind: output, shape index: {}]  }
   0x1   :  { %s9_s14 = sshll.u32 %s709_s0, 4  ;;  %s10_s14 = int_to_ptr.hbm [resolvable:$true] %s9_s14 }
   0x2   :  { %12 = dma.hbm_to_smem %s10_s14, 16, %s554_s15, [#allocation4] }
   0x3   :  { %510 = dma.done.wait [#allocation4], 16 }
   0x4   :  { %511 = vsyncadd [#allocation4], 4294967280 }
   0x5   :  { %15 = sfence }
   0x6   :  { %16 = vsyncpa [#allocation7], 0 }
   0x7   :  { %17 = vsyncpa [#allocation8], 0 }
   0x8   :  { %19 = vsyncpa [#allocation8 + $0x1], 0  ;;  %s580_s16 = smov 0   ;;  %s582_s17 = smov 0  }
   0x9   :  { %s584_s18 = smov 0   ;;  %s586_s19 = smov 0  }
   0xa   :  { %s588_s20 = smov 0   ;;  %s590_s0 = smov 0  }
   0xb LB: > { %s288_s21 = sadd.s32 4294967295, %s544_s0   ;;  %s289_s22 = sadd.s32 4294967294, %s544_s0   ;;  %s544_s0 = sphi %s590_s0, %s25_s0   ;;  %s540_s20 = sphi %s588_s20, %s721_s20   ;;  %s536_s19 = sphi %s586_s19, %s720_s19   ;;  %s532_s18 = sphi %s584_s18, %s719_s18   ;;  %s528_s17 = sphi %s582_s17, %s718_s17   ;;  %s524_s16 = sphi %s580_s16, %s717_s16  }
   0xc   : > { %s34_s23 = sadd.s32 1, %s540_s20  ;;  %s72_s24 = sadd.s32 1, %s532_s18 }
   0xd   : > { %p35_p0 = scmp.ge.s32.totalorder %s34_s23, 2  ;;  %p82_p1 = scmp.ne.s32.totalorder %s532_s18, %s528_s17 }
   0xe   : > { %p83_p2 = scmp.eq.s32.totalorder %s288_s21, 1  ;;  %p88_p3 = scmp.ne.s32.totalorder %s528_s17, %s524_s16 }
   0xf   : > { %s723_s23 = smov (%p35_p0, %s34_s23), 0  ;;  %p89_p5 = scmp.eq.s32.totalorder %s289_s22, 1 }
  0x10   : > { %p620_p4 = por %p83_p2, %p82_p1  ;;  %s69_s26 = ssub.s32 %s540_s20, %s723_s23 }
  0x11   : > { %p290_p6 = scmp.ge.s32.totalorder %s544_s0, 1  ;;  %p70_p7 = scmp.eq.s32.totalorder %s69_s26, 0 }
  0x12   : > { %p627_p8 = por %p89_p5, %p88_p3  ;;  %p96_p9 = scmp.lt.s32.totalorder %s544_s0, 3 }
  0x13   : > { %s633_s28 = scalar_select %p70_p7, %s532_s18, %s72_s24  }
  0x14   : > { %p97_p10 = pnand %p290_p6, %p96_p9  ;;  %p315_p11 = scmp.eq.s32.totalorder %s288_s21, 0 }
  0x15   : > { %s110_s4 = sshll.u32 %s711_s2, 4  ;;  %s555_s5 = smov [#allocation6]   ;;  %s111_s4 = int_to_ptr.hbm [resolvable:$true] %s110_s4 }
  0x16   : > { %p307_p12 = pneg %p97_p10  ;;  %s112_s6 = sshll.u32 %s555_s5, 4  ;;  %s113_s6 = int_to_ptr.vmem [resolvable:$true] %s112_s6 }
  0x17   : > { %125 = sbr.rel (%p97_p10) target bundleno = 89 (0x59), region = 24 }
  0x18   : > { %p308_p13 = pnand %p315_p11, %p307_p12 }
  0x1a   : > { %310 = dma.hbm_to_vmem [thread:$0]  (!%p308_p13), %s111_s4, 128, %s113_s6, [#allocation7]  }
  0x1c   : > { %513 = dma.done.wait (%p315_p11), [#allocation7], 128  }
  0x1d   : > { %515 = vsyncadd (%p315_p11), [#allocation7], 4294967168  ;;  %s713_s7 = sand.u32 1, %s528_s17   ;;  %s295_s8 = sshll.u32 %s536_s19, 3 }
  0x1e   : > { %s642_s9 = sshll.u32 %s713_s7, 3  ;;  %s645_s11 = smov 0  }
  0x1f   : > { %s140_s10 = scalar_lea.vmem [#allocation9], %s642_s9 }
  0x20 LB: >> { %s151_s12 = sadd.s32 %s548_s11, %s295_s8  ;;  %s156_s14 = scalar_lea.vmem [#allocation2], %s548_s11  ;;  %s548_s11 = sphi %s645_s11, %s150_s11  }
  0x21   : >> { %s152_s13 = sld [smem:[#allocation5 + %s151_s12]]  ;;  %s166_s15 = sshll.u32 %s156_s14, 4  ;;  %s167_s15 = int_to_ptr.vmem [resolvable:$true] %s166_s15 }
  0x22   : >> { %s430_s6 = scalar_lea.hbm %s710_s1, 64 }
  0x27   : >> { %p153_p0 = scmp.lt.s32.totalorder %s152_s13, 63 }
  0x29   : >> { %s725_s13 = smov (!%p153_p0, %s152_s13), 63 }
  0x2a   : >> { %s155_s24 = scalar_lea.hbm %s710_s1, %s725_s13 }
  0x2b   : >> { %s164_s26 = sshll.u32 %s155_s24, 4  ;;  %s165_s26 = int_to_ptr.hbm [resolvable:$true] %s164_s26 }
  0x2c   : >> { %s426_s29 = sshra.s32 %s165_s26, 4  ;;  %s427_s29 = int_to_ptr.hbm [resolvable:$true] %s426_s29 }
  0x2d   : >> { %s428_s30 = scalar_lea.hbm %s427_s29, 1  ;;  %p431_p2 = scmp.lt.s32.totalorder %s427_s29, %s710_s1 }
  0x2e   : >> { %p429_p1 = scmp.ne.s32.totalorder %s427_s29, %s428_s30  ;;  %p432_p3 = scmp.lt.s32.totalorder %s430_s6, %s428_s30 }
  0x30   : >> { %p433_p5 = por %p432_p3, %p431_p2 }
  0x32   : >> { %p434_p6 = pnand %p433_p5, %p429_p1 }
  0x34   : >> { %437 = shalt.err (!%p434_p6)  }
  0x35   : >> { %s438_s13 = sshra.s32 %s167_s15, 4  ;;  %s556_s21 = smov [#allocation2]   ;;  %s439_s13 = int_to_ptr.vmem [resolvable:$true] %s438_s13 }
  0x36   : >> { %s440_s14 = scalar_lea.vmem %s439_s13, 1  ;;  %s442_s22 = scalar_lea.vmem %s556_s21, 8 }
  0x37   : >> { %p441_p7 = scmp.ne.s32.totalorder %s439_s13, %s440_s14  ;;  %p443_p9 = scmp.lt.s32.totalorder %s439_s13, [#allocation2] }
  0x38   : >> { %p444_p10 = scmp.lt.s32.totalorder %s442_s22, %s440_s14 }
  0x3a   : >> { %p445_p11 = por %p444_p10, %p443_p9 }
  0x3c   : >> { %p446_p12 = pnand %p445_p11, %p441_p7 }
  0x3e   : >> { %449 = shalt.err (!%p446_p12)  }
  0x3f   : >> { %169 = dma.hbm_to_vmem [thread:$0]  %s165_s26, 16, %s167_s15, [#allocation3] }
  0x40   : >> { %s150_s11 = sadd.s32 1, %s548_s11  }
  0x41   : >> { %p147_p13 = scmp.ge.s32.totalorder %s150_s11, 8  }
  0x42   : > { %s550_s7 = smov (%p147_p13), 0  }
  0x43   : > { %149 = sbr.rel (!%p147_p13) target bundleno = 32 (0x20), region = 82 }
  0x48 LB: >> { %516 = dma.done.wait [#allocation3], 16  ;;  %s552_s7 = sphi %s550_s7, %s175_s7  }
  0x49   : >> { %517 = vsyncadd [#allocation3], 4294967280  ;;  %s175_s7 = sadd.s32 1, %s552_s7  }
  0x4a   : >> { %p172_p0 = scmp.ge.s32.totalorder %s175_s7, 8  }
  0x4b   : > { %v179_v0 = vld [vmem:[#allocation2] sm:$0xff] (%p172_p0)  ;;  %v180_v1 = vld [vmem:[#allocation6] sm:$0xff] (%p172_p0)  ;;  %s195_s24 = scalar_lea.hbm (%p172_p0), %s712_s3, %s295_s8  ;;  %s197_s26 = sshll.u32 (%p172_p0), %s140_s10, 4  ;;  %s198_s26 = int_to_ptr.vmem [resolvable:$true] %s197_s26 }
  0x4c   : > { %174 = sbr.rel (!%p172_p0) target bundleno = 72 (0x48), region = 93  ;;  %v181_v2 = vadd.f32 (%p172_p0), %v180_v1, %v179_v0  ;;  %s199_s29 = sshll.u32 (%p172_p0), %s195_s24, 4  ;;  %s200_s29 = int_to_ptr.hbm [resolvable:$true] %s199_s29 }
  0x4d   : > { %s716_s30 = sand.u32 (%p172_p0), 1, %s528_s17   ;;  %s464_s5 = sshra.s32 (%p172_p0), %s200_s29, 4  ;;  %s465_s5 = int_to_ptr.hbm [resolvable:$true] %s464_s5 }
  0x4e   : > { %182 = vst [vmem:[%s140_s10] sm:$0xff] (%p172_p0), %v181_v2  ;;  %s184_s4 = scalar_lea.sflag (%p172_p0), [#allocation8], %s716_s30  ;;  %s466_s6 = scalar_lea.hbm (%p172_p0), %s465_s5, 8 }
  0x4f   : > { %p467_p1 = scmp.ne.s32.totalorder (%p172_p0), %s465_s5, %s466_s6  ;;  %s470_s8 = scalar_lea.hbm (%p172_p0), %s712_s3, 16 }
  0x50   : > { %p471_p5 = scmp.lt.s32.totalorder (%p172_p0), %s465_s5, %s712_s3  ;;  %p472_p6 = scmp.lt.s32.totalorder (%p172_p0), %s470_s8, %s466_s6 }
  0x51   : > { %p468_p2 = pnand %p467_p1, %p620_p4 }
  0x52   : > { %p473_p7 = por %p472_p6, %p471_p5 }
  0x53   : > { %p469_p3 = pneg %p468_p2 }
  0x55   : > { %p474_p9 = pnand %p473_p7, %p469_p3 }
  0x57   : > { %477 = shalt.err (!%p474_p9)
}
  0x58   : > { %305 = dma.vmem_to_hbm [thread:$0]  (%p620_p4), %s198_s26, 128, %s200_s29, %s184_s4  }
  0x59 PF: > { %p317_p10 = scmp.ge.s32.totalorder %s544_s0, 2  ;;  %s211_s9 = sand.u32 1, %s524_s16  }
  0x5a   : > { %s212_s10 = scalar_lea.sflag [#allocation8], %s211_s9 }
  0x5b   : > { %p312_p11 = pnand %p317_p10, %p627_p8 }
  0x5d   : > { %p313_p12 = pneg %p312_p11 }
  0x5f   : > { %519 = dma.done.wait (%p313_p12), %s212_s10, 128  }
  0x60   : > { %521 = vsyncadd (%p313_p12), %s212_s10, 4294967168  ;;  %s25_s0 = sadd.s32 1, %s544_s0   ;;  %s717_s16 = smov %s528_s17 }
  0x61   : > { %p22_p13 = scmp.ge.s32.totalorder %s25_s0, 4   ;;  %s718_s17 = smov %s532_s18 }
  0x62   : > { %s719_s18 = smov %s633_s28  ;;  %s720_s19 = smov %s540_s20 }
  0x63   : > { %s721_s20 = smov %s723_s23  ;;  %24 = sbr.rel (!%p22_p13) target bundleno = 11 (0xb), region = 104 }
  0x68   :  { %218 = vsyncpa [#allocation7], 1 }
  0x69   :  { %220 = vsyncpa [#allocation7 + $0x1], 1 }
  0x6a   :  { %221 = vsyncpa [#allocation8], 1 }
  0x6b   :  { %223 = vsyncpa [#allocation8 + $0x1], 1 }
  0x6c   :  { %224 = vsyncmov [#allocation3] }
  0x6f   :  { %s225_s25 = vpop.sfrf %224 }
  0x70   :  { %p300_p4 = scmp.ne.s32.totalorder %s225_s25, 0 }
  0x72   :  { %229 = shalt.err (%p300_p4)  }

</bundles_post_ra>
